<compile_context>
chip_gen: v6e
topology: v6e:2x2x1
jax: 0.10.0
libtpu: 0.0.40
codegen_flags: <defaults>
</compile_context>

<pallas_src>
import jax
import jax.numpy as jnp
from jax.experimental import pallas as pl
from jax.experimental.pallas import tpu as pltpu

IN_FEATURES = 8
OUT_FEATURES = 1

_LANE = 128
_MAX_TB = 64 * 1024   # (8, TB) f32 input buffer = 2 MiB; double-buffered + output
                      # buffers < 5 MiB -> within default scoped VMEM on v5e/v6e/v7x.
_SMALL_B = 1024       # below this the grid / transpose plumbing is pure overhead


def _gelu_tail(w1):
    # Exactly the elementwise tail of Model.forward (tanh goes to the EUP).
    w2 = w1 * 0.5
    w3 = w1 + w2 * w1 * w2 * 0.044715
    w4 = w3 * 0.7978845608028654
    w5 = jnp.tanh(w4)
    w6 = w5 + 1.0
    return w2 * w6


def _gelu_linear_kernel(b_ref, w_ref, x_ref, o_ref):
    # b_ref: SMEM (1,)      f32 -- bias scalar
    # w_ref: VMEM (8, 1)    f32 -- weight column, lane-broadcast once
    # x_ref: VMEM (8, TB)   f32 -- features on sublanes, batch on lanes
    # o_ref: VMEM (1, TB)   f32 -- lane-dense output tile
    # Dense multiply of the full tile + sublane reduce (XLU) replaces the
    # previous 8 serial (1, TB) FMAs.
    w1 = jnp.sum(x_ref[...] * w_ref[...], axis=0, keepdims=True) + b_ref[0]
    o_ref[...] = _gelu_tail(w1)


def _gelu_linear_small_kernel(w_ref, b_ref, x_ref, o_ref):
    # Tiny-batch path: x stays in its natural (B, 8) layout, one block.
    # w_ref: VMEM (1, 8); b_ref: SMEM (1,); x_ref: VMEM (B, 8); o_ref: (B, 1).
    w1 = jnp.sum(x_ref[...] * w_ref[...], axis=1, keepdims=True) + b_ref[0]
    o_ref[...] = _gelu_tail(w1)


def _round_up(v, m):
    return ((v + m - 1) // m) * m


def _pick_tb(B):
    # Largest lane tile that (a) keeps >= 2 grid steps (v7x two-TC sharding of
    # the "parallel" axis), (b) is a multiple of 128 lanes, (c) caps the
    # double-buffered VMEM footprint at a few MiB on every generation.
    half = _round_up(pl.cdiv(B, 2), _LANE)
    return int(min(max(half, _LANE), _MAX_TB))


def gelu_linear(x, weight, bias):
    """x: (B, 8); weight: (1, 8) (PyTorch Linear layout); bias: (1,).

    Returns (B, 1) f32, matching Model.forward.
    """
    B = x.shape[0]
    x32 = x.astype(jnp.float32)
    w_row = weight.reshape(OUT_FEATURES, IN_FEATURES).astype(jnp.float32)   # (1, 8)
    b_flat = bias.reshape(OUT_FEATURES).astype(jnp.float32)                 # (1,)

    if B <= _SMALL_B:
        # Fast path: single block, no transpose, no pipelining.
        return pl.pallas_call(
            _gelu_linear_small_kernel,
            out_shape=jax.ShapeDtypeStruct((B, OUT_FEATURES), jnp.float32),
            grid=(1,),
            in_specs=[
                pl.BlockSpec((OUT_FEATURES, IN_FEATURES), lambda i: (0, 0)),  # weight row
                pl.BlockSpec(memory_space=pltpu.SMEM),                        # bias
                pl.BlockSpec((B, IN_FEATURES), lambda i: (0, 0)),             # x
            ],
            out_specs=pl.BlockSpec((B, OUT_FEATURES), lambda i: (0, 0)),
        )(w_row, b_flat, x32)

    # Large-batch path: exactly one transpose so batch is the lane axis; the
    # ragged tail tile is handled by Pallas block masking (no zero-padded copy).
    x_t = x32.T                                            # (8, B)
    w_col = w_row.reshape(IN_FEATURES, OUT_FEATURES)       # (8, 1)

    TB = _pick_tb(B)
    n_tiles = pl.cdiv(B, TB)

    cost = pl.CostEstimate(
        flops=26 * B,
        transcendentals=B,
        bytes_accessed=4 * B * (IN_FEATURES + OUT_FEATURES) + 4 * (IN_FEATURES + 1),
    )

    out_t = pl.pallas_call(
        _gelu_linear_kernel,
        out_shape=jax.ShapeDtypeStruct((OUT_FEATURES, B), jnp.float32),
        grid=(n_tiles,),
        in_specs=[
            pl.BlockSpec(memory_space=pltpu.SMEM),                         # bias
            pl.BlockSpec((IN_FEATURES, OUT_FEATURES), lambda i: (0, 0)),   # weight col
            pl.BlockSpec((IN_FEATURES, TB), lambda i: (0, i)),             # x tile
        ],
        out_specs=pl.BlockSpec((OUT_FEATURES, TB), lambda i: (0, i)),
        compiler_params=pltpu.CompilerParams(
            dimension_semantics=("parallel",),
        ),
        cost_estimate=cost,
    )(b_flat, w_col, x_t)

    # (1, B) row-major has the same element order as (B, 1): reshape, no shuffle.
    return out_t.reshape(B, OUT_FEATURES)


def _reference(x, weight, bias):
    # Mirrors Model.forward with PyTorch Linear conventions.
    w1 = x @ weight.T + bias
    w2 = w1 * 0.5
    w3 = w1 + w2 * w1 * w2 * 0.044715
    w4 = w3 * 0.7978845608028654
    w5 = jnp.tanh(w4)
    w6 = w5 + 1.0
    return w2 * w6


if __name__ == "__main__":
    key = jax.random.PRNGKey(0)
    kx, kw, kb, kx2 = jax.random.split(key, 4)

    # Deterministic init mirroring nn.Linear's uniform(-1/sqrt(in), 1/sqrt(in)),
    # PyTorch layout: weight (out_features, in_features), bias (out_features,).
    bound = 1.0 / (IN_FEATURES ** 0.5)
    weight = jax.random.uniform(
        kw, (OUT_FEATURES, IN_FEATURES), jnp.float32, -bound, bound)
    bias = jax.random.uniform(kb, (OUT_FEATURES,), jnp.float32, -bound, bound)

    # Small batch consistent with the module's (1, 8) input; use batch=2.
    x_small = jax.random.normal(kx, (2, IN_FEATURES), jnp.float32)
    out_small = gelu_linear(x_small, weight, bias)
    jax.block_until_ready(out_small)
    ref_small = _reference(x_small, weight, bias)
    assert out_small.shape == (2, OUT_FEATURES)
    assert jnp.allclose(out_small, ref_small, atol=1e-5, rtol=1e-5)

    # Also exercise the tiled large-batch path, including a ragged tail tile.
    x_big = jax.random.normal(kx2, (3000, IN_FEATURES), jnp.float32)
    out_big = gelu_linear(x_big, weight, bias)
    jax.block_until_ready(out_big)
    ref_big = _reference(x_big, weight, bias)
    assert out_big.shape == (3000, OUT_FEATURES)
    assert jnp.allclose(out_big, ref_big, atol=1e-5, rtol=1e-5)

    print("KERNEL_OK")
</pallas_src>

<mosaic_0001>
module attributes {stable_mosaic.version = 11 : i64} {
  func.func @_gelu_linear_small_kernel(%arg0: i32, %arg1: memref<1x8xf32, #tpu.memory_space<vmem>>, %arg2: memref<1xf32, #tpu.memory_space<smem>>, %arg3: memref<2x8xf32, #tpu.memory_space<vmem>>, %arg4: memref<2x1xf32, #tpu.memory_space<vmem>>) attributes {dimension_semantics = [#tpu.dimension_semantics<arbitrary>], iteration_bounds = array<i64: 1>, scalar_prefetch = 0 : i64, scratch_operands = 0 : i64, tpu.core_type = #tpu.core_type<tc>, window_params = [{pipeline_mode = #tpu.pipeline_mode<synchronous>, transform_indices = @transform_0, window_bounds = array<i64: 1, 8>}, {transform_indices = @transform_1, window_bounds = array<i64: 1>}, {pipeline_mode = #tpu.pipeline_mode<synchronous>, transform_indices = @transform_2, window_bounds = array<i64: 2, 8>}, {pipeline_mode = #tpu.pipeline_mode<synchronous>, transform_indices = @transform_3, window_bounds = array<i64: 2, 1>}]} {
    %c0 = arith.constant 0 : index
    %c0_0 = arith.constant 0 : index
    %0 = vector.load %arg3[%c0, %c0_0] : memref<2x8xf32, #tpu.memory_space<vmem>>, vector<2x8xf32>
    %c0_1 = arith.constant 0 : index
    %c0_2 = arith.constant 0 : index
    %1 = vector.load %arg1[%c0_1, %c0_2] : memref<1x8xf32, #tpu.memory_space<vmem>>, vector<1x8xf32>
    %2 = vector.broadcast %1 : vector<1x8xf32> to vector<2x8xf32>
    %3 = arith.mulf %0, %2 : vector<2x8xf32>
    %cst = arith.constant dense<0.000000e+00> : vector<2xf32>
    %4 = vector.multi_reduction <add>, %3, %cst [1] : vector<2x8xf32> to vector<2xf32>
    %5 = vector.shape_cast %4 : vector<2xf32> to vector<2x1xf32>
    %c0_3 = arith.constant 0 : index
    %6 = memref.load %arg2[%c0_3] : memref<1xf32, #tpu.memory_space<smem>>
    %7 = vector.broadcast %6 : f32 to vector<2x1xf32>
    %8 = arith.addf %5, %7 : vector<2x1xf32>
    %cst_4 = arith.constant 5.000000e-01 : f32
    %9 = vector.broadcast %cst_4 : f32 to vector<2x1xf32>
    %10 = arith.mulf %8, %9 : vector<2x1xf32>
    %11 = arith.mulf %10, %8 : vector<2x1xf32>
    %12 = arith.mulf %11, %10 : vector<2x1xf32>
    %cst_5 = arith.constant 4.471500e-02 : f32
    %13 = vector.broadcast %cst_5 : f32 to vector<2x1xf32>
    %14 = arith.mulf %12, %13 : vector<2x1xf32>
    %15 = arith.addf %8, %14 : vector<2x1xf32>
    %cst_6 = arith.constant 0.797884583 : f32
    %16 = vector.broadcast %cst_6 : f32 to vector<2x1xf32>
    %17 = arith.mulf %15, %16 : vector<2x1xf32>
    %18 = math.tanh %17 : vector<2x1xf32>
    %cst_7 = arith.constant 1.000000e+00 : f32
    %19 = vector.broadcast %cst_7 : f32 to vector<2x1xf32>
    %20 = arith.addf %18, %19 : vector<2x1xf32>
    %21 = arith.mulf %10, %20 : vector<2x1xf32>
    %c0_8 = arith.constant 0 : index
    %c0_9 = arith.constant 0 : index
    %22 = vector.load %arg4[%c0_8, %c0_9] : memref<2x1xf32, #tpu.memory_space<vmem>>, vector<2x1xf32>
    tpu.vector_store %arg4[%c0_8, %c0_9], %21 {strides = array<i32>} : memref<2x1xf32, #tpu.memory_space<vmem>>, vector<2x1xf32>,
    return
  }
  func.func @transform_0(%arg0: i32) -> (i32, i32) {
    %c0_i32 = arith.constant 0 : i32
    %c0_i32_0 = arith.constant 0 : i32
    %c0_i32_1 = arith.constant 0 : i32
    return %c0_i32, %c0_i32_0 : i32, i32
  }
  func.func @transform_1(%arg0: i32) -> i32 {
    %c0_i32 = arith.constant 0 : i32
    %c0_i32_0 = arith.constant 0 : i32
    return %c0_i32 : i32
  }
  func.func @transform_2(%arg0: i32) -> (i32, i32) {
    %c0_i32 = arith.constant 0 : i32
    %c0_i32_0 = arith.constant 0 : i32
    %c0_i32_1 = arith.constant 0 : i32
    return %c0_i32, %c0_i32_0 : i32, i32
  }
  func.func @transform_3(%arg0: i32) -> (i32, i32) {
    %c0_i32 = arith.constant 0 : i32
    %c0_i32_0 = arith.constant 0 : i32
    %c0_i32_1 = arith.constant 0 : i32
    return %c0_i32, %c0_i32_0 : i32, i32
  }
}

</mosaic_0001>

<bundles_post_ra>
// kernel: tpu_custom_call.1
= control target key start
LH: loop header
LB: loop body
LE: loop exit
PB: predicated region body
PF: predicated region fallthrough
CT: control target
= control target key end

     0   :  { %vm24_vm0 = vcmask 58368   ;;  %vm40_vm1 = vcmask 1024   ;;  %s81_s0 = inlined_call_operand.vmem [shape: f32[1,8], index: 0, kind: input, shape index: {}]   ;;  %s82_s2 = inlined_call_operand.vmem [shape: f32[2,8], index: 2, kind: input, shape index: {}]   ;;  %s83_s1 = inlined_call_operand.<no memory space> [shape: f32[1], index: 1, kind: input, shape index: {}]   ;;  %s84_s3 = inlined_call_operand.vmem [shape: f32[2,1], index: 3, kind: output, shape index: {}]  }
   0x1   :  { %v15_v0 = vld [vmem:[%s82_s2] sm:$0x3]  ;;  %v29_v4 = vstv %s83_s1 }
   0x2   :  { %v46_v1 = vld [vmem:[%s81_s0] ss:$0 sm:$0xff] }
   0x3   :  { %v23_v2 = vmul.f32 %v46_v1, %v15_v0 }
   0x5   :  { %v25_v3 = vsel %vm24_vm0, %v23_v2, 0.0 }
   0x6   :  { %26 = vadd.xlane.f32.xlu0 %v25_v3 }
  0x8f   :  { %v27_v5 = vpop.xlane.xlu0 %26 }
  0x90   :  { %v30_v6 = vadd.f32 %v29_v4, %v27_v5 }
  0x92   :  { %v31_v7 = vmul.f32 0.5, %v30_v6 }
  0x94   :  { %v32_v8 = vmul.f32 %v31_v7, %v30_v6 }
  0x96   :  { %v33_v9 = vmul.f32 %v32_v8, %v31_v7 }
  0x98   :  { %v34_v10 = vmul.f32 0.044715, %v33_v9 }
  0x9a   :  { %v35_v11 = vadd.f32 %v34_v10, %v30_v6 }
  0x9c   :  { %v36_v12 = vmul.f32 0.7978846, %v35_v11 }
  0x9e   :  { %47 = vtanh.f32 %v36_v12 }
  0xab   :  { %v48_v13 = vpop.eup %47 }
  0xac   :  { %v38_v14 = vadd.f32 1.0, %v48_v13 }
  0xae   :  { %v39_v15 = vmul.f32 %v38_v14, %v31_v7 }
  0xb0   :  { %41 = vst.msk [vmem:[%s84_s3] sm:$0x3] %vm40_vm1, %v39_v15 }

</bundles_post_ra>
